<compile_context>
chip_gen: v6e
topology: v6e:2x2x1
jax: 0.10.0
libtpu: 0.0.40
codegen_flags: <defaults>
</compile_context>

<pallas_src>
import functools

import numpy as np
import jax
import jax.numpy as jnp
from jax.experimental import pallas as pl
from jax.experimental.pallas import tpu as pltpu


def _round_up(x, m):
    return ((x + m - 1) // m) * m


def _spectral_loss_kernel(frames_ref, basis_ref, out_ref, *, alpha, row_block, f_pad):
    """One grid step: fused windowed DFT (single MXU matmul), magnitude compression,
    squared-error per-lane partial sums accumulated into the resident output block."""
    i = pl.program_id(1)

    @pl.when(i == 0)
    def _():
        out_ref[...] = jnp.zeros_like(out_ref)

    R = row_block
    F = f_pad

    fr = frames_ref[...]        # (2R, n_fft) bf16 : rows [0:R]=pred frames, [R:2R]=target frames
    basis = basis_ref[...]      # (n_fft, 2F) bf16 : lanes [0:F]=w*cos, [F:2F]=-(w*sin)

    # One-sided STFT of both signals in a single (2R,128)x(128,256) MXU matmul (f32 acc).
    ri = jnp.dot(fr, basis, preferred_element_type=jnp.float32)     # (2R, 2F)

    p_re = ri[:R, :F]
    p_im = ri[:R, F:]
    t_re = ri[R:, :F]
    t_im = ri[R:, F:]

    p_msq = p_re * p_re + p_im * p_im
    t_msq = t_re * t_re + t_im * t_im

    tiny = jnp.float32(1e-24)          # keeps padded zero bins finite; diff still exactly 0
    half_alpha = jnp.float32(0.5 * alpha)
    # |X|^alpha = exp(alpha/2 * log(|X|^2))   (one log + one exp on the EUP)
    p_mc = jnp.exp(half_alpha * jnp.log(p_msq + tiny))
    t_mc = jnp.exp(half_alpha * jnp.log(t_msq + tiny))

    # 1/(|X| + 1e-8) ~= rsqrt(|X|^2 + 1e-16); only differs for near-zero bins (contribute ~0)
    p_fac = p_mc * jax.lax.rsqrt(p_msq + jnp.float32(1e-16))
    t_fac = t_mc * jax.lax.rsqrt(t_msq + jnp.float32(1e-16))

    mag_sq = (p_mc - t_mc) ** 2
    cx_sq = (p_fac * p_re - t_fac * t_re) ** 2 + (p_fac * p_im - t_fac * t_im) ** 2

    # Per-lane partial sums: pure VPU adds across 8-row groups (cross-lane reduce deferred).
    out_ref[:, :F] += jnp.sum(mag_sq.reshape(R // 8, 8, F), axis=0)
    out_ref[:, F:] += jnp.sum(cx_sq.reshape(R // 8, 8, F), axis=0)


def compressed_spectral_loss(predicted, target, *, alpha=0.3, beta=0.85,
                             n_fft=128, hop_length=128, row_block=256):
    predicted = predicted.astype(jnp.float32)
    target = target.astype(jnp.float32)
    B, T = predicted.shape

    # --- glue (plain JAX): delay shift, center reflect-padding, framing, DFT basis ---
    delay = 64
    target = jnp.concatenate(
        [jnp.zeros((B, delay), jnp.float32), target[:, :-delay]], axis=1)

    pad = n_fft // 2  # torch.stft(center=True, pad_mode='reflect')
    p_pad = jnp.pad(predicted, ((0, 0), (pad, pad)), mode="reflect")
    t_pad = jnp.pad(target, ((0, 0), (pad, pad)), mode="reflect")

    L = p_pad.shape[1]
    n_frames = 1 + (L - n_fft) // hop_length
    if hop_length == n_fft:
        # Non-overlapping frames: framing is a free reshape (no gather copy in HBM).
        p_fr = p_pad[:, :n_frames * n_fft].reshape(B, n_frames, n_fft)
        t_fr = t_pad[:, :n_frames * n_fft].reshape(B, n_frames, n_fft)
    else:
        idx = jnp.arange(n_frames)[:, None] * hop_length + jnp.arange(n_fft)[None, :]
        p_fr = p_pad[:, idx]
        t_fr = t_pad[:, idx]
    p_frames = p_fr.reshape(B * n_frames, n_fft)
    t_frames = t_fr.reshape(B * n_frames, n_fft)

    rows = B * n_frames

    # --- grid sizing: large row blocks; second TensorCore used via a "parallel" axis ---
    if rows >= 2 * row_block:
        num_splits = 2              # near-2x on v7x megacore; harmless on v5e/v6e
    else:
        num_splits = 1
        row_block = min(row_block, _round_up(rows, 8))   # small input -> single grid step
    rows_pad = _round_up(rows, num_splits * row_block)
    steps = rows_pad // (num_splits * row_block)
    nblk = rows_pad // row_block

    p_frames = jnp.pad(p_frames, ((0, rows_pad - rows), (0, 0)))
    t_frames = jnp.pad(t_frames, ((0, rows_pad - rows), (0, 0)))

    # Interleave pred/target block-wise so each grid step reads one contiguous
    # (2*row_block, n_fft) tile: rows [0:R]=pred block, [R:2R]=target block.  bf16 halves DMA.
    stacked = jnp.concatenate(
        [p_frames.reshape(nblk, row_block, n_fft),
         t_frames.reshape(nblk, row_block, n_fft)], axis=1,
    ).reshape(nblk * 2 * row_block, n_fft).astype(jnp.bfloat16)

    # Periodic Hamming window (torch.hamming_window default periodic=True)
    n = jnp.arange(n_fft, dtype=jnp.float32)
    window = 0.54 - 0.46 * jnp.cos(2.0 * jnp.pi * n / n_fft)

    n_freq = n_fft // 2 + 1
    f_pad = _round_up(n_freq, 128)           # pad freq bins to full lane width
    f = jnp.arange(f_pad, dtype=jnp.float32)
    ang = 2.0 * jnp.pi * n[:, None] * f[None, :] / n_fft
    fmask = (jnp.arange(f_pad) < n_freq).astype(jnp.float32)[None, :]
    cos_b = (window[:, None] * jnp.cos(ang)) * fmask
    nsin_b = -(window[:, None] * jnp.sin(ang)) * fmask    # minus sign baked into the basis
    basis = jnp.concatenate([cos_b, nsin_b], axis=1).astype(jnp.bfloat16)   # (n_fft, 2*f_pad)

    # --- Pallas kernel: one MXU matmul + EUP-lean elementwise + per-lane accumulation ---
    partials = pl.pallas_call(
        functools.partial(_spectral_loss_kernel, alpha=alpha,
                          row_block=row_block, f_pad=f_pad),
        out_shape=jax.ShapeDtypeStruct((num_splits * 8, 2 * f_pad), jnp.float32),
        grid=(num_splits, steps),
        in_specs=[
            pl.BlockSpec((2 * row_block, n_fft), lambda c, i: (c * steps + i, 0)),
            pl.BlockSpec((n_fft, 2 * f_pad), lambda c, i: (0, 0)),   # constant, stays resident
        ],
        out_specs=pl.BlockSpec((8, 2 * f_pad), lambda c, i: (c, 0)),  # per-core accumulator
        compiler_params=pltpu.CompilerParams(
            dimension_semantics=("parallel", "arbitrary")),
    )(stacked, basis)

    count = B * n_freq * n_frames  # torch.mean is over all (B, n_freq, n_frames) elements
    mag_loss = jnp.sum(partials[:, :f_pad]) / count
    complex_loss = jnp.sum(partials[:, f_pad:]) / count
    return (1.0 - beta) * mag_loss + beta * complex_loss


def reference_loss(predicted, target, alpha=0.3, beta=0.85, n_fft=128, hop_length=128):
    """Pure-JAX reference mirroring the torch module (for a sanity check)."""
    predicted = predicted.astype(jnp.float32)
    target = target.astype(jnp.float32)
    B, T = predicted.shape
    delay = 64
    target = jnp.concatenate(
        [jnp.zeros((B, delay), jnp.float32), target[:, :-delay]], axis=1)
    pad = n_fft // 2
    p_pad = jnp.pad(predicted, ((0, 0), (pad, pad)), mode="reflect")
    t_pad = jnp.pad(target, ((0, 0), (pad, pad)), mode="reflect")
    M = 1 + (p_pad.shape[1] - n_fft) // hop_length
    idx = jnp.arange(M)[:, None] * hop_length + jnp.arange(n_fft)[None, :]
    n = jnp.arange(n_fft, dtype=jnp.float32)
    window = 0.54 - 0.46 * jnp.cos(2.0 * jnp.pi * n / n_fft)
    pf = p_pad[:, idx] * window
    tf = t_pad[:, idx] * window
    f = jnp.arange(n_fft // 2 + 1, dtype=jnp.float32)
    basis = jnp.exp(-2j * jnp.pi * n[:, None] * f[None, :] / n_fft)
    p_stft = jnp.einsum("bmn,nf->bmf", pf.astype(jnp.complex64), basis)
    t_stft = jnp.einsum("bmn,nf->bmf", tf.astype(jnp.complex64), basis)
    p_mag = jnp.abs(p_stft)
    t_mag = jnp.abs(t_stft)
    p_mc = p_mag ** alpha
    t_mc = t_mag ** alpha
    p_ph = p_stft / (p_mag + 1e-8)
    t_ph = t_stft / (t_mag + 1e-8)
    mag_loss = jnp.mean((p_mc - t_mc) ** 2)
    cx_loss = jnp.mean(jnp.abs(p_mc * p_ph - t_mc * t_ph) ** 2)
    return (1.0 - beta) * mag_loss + beta * cx_loss


if __name__ == "__main__":
    key = jax.random.PRNGKey(0)
    k1, k2 = jax.random.split(key)
    B, T = 2, 512
    predicted = jax.random.normal(k1, (B, T), dtype=jnp.float32)
    target = jax.random.normal(k2, (B, T), dtype=jnp.float32)

    loss = compressed_spectral_loss(predicted, target)
    loss = jax.block_until_ready(loss)

    ref = reference_loss(predicted, target)
    assert np.isfinite(float(loss))
    np.testing.assert_allclose(float(loss), float(ref), rtol=5e-2, atol=1e-4)

    print("KERNEL_OK")
</pallas_src>

<mosaic_0001>
module attributes {stable_mosaic.version = 11 : i64} {
  func.func @_spectral_loss_kernel(%arg0: i32, %arg1: i32, %arg2: memref<32x128xbf16, #tpu.memory_space<vmem>>, %arg3: memref<128x256xbf16, #tpu.memory_space<vmem>>, %arg4: memref<8x256xf32, #tpu.memory_space<vmem>>) attributes {dimension_semantics = [#tpu.dimension_semantics<parallel>, #tpu.dimension_semantics<arbitrary>], iteration_bounds = array<i64: 1, 1>, scalar_prefetch = 0 : i64, scratch_operands = 0 : i64, tpu.core_type = #tpu.core_type<tc>, window_params = [{transform_indices = @transform_0, window_bounds = array<i64: 32, 128>}, {pipeline_mode = #tpu.pipeline_mode<synchronous>, transform_indices = @transform_1, window_bounds = array<i64: 128, 256>}, {transform_indices = @transform_2, window_bounds = array<i64: 8, 256>}]} {
    %c0_i32 = arith.constant 0 : i32
    %0 = arith.cmpi eq, %arg1, %c0_i32 : i32
    %1 = arith.extui %0 : i1 to i32
    %c0_i32_0 = arith.constant 0 : i32
    %2 = arith.cmpi ne, %1, %c0_i32_0 : i32
    scf.if %2 {
      %cst_19 = arith.constant 0.000000e+00 : f32
      %57 = vector.broadcast %cst_19 : f32 to vector<8x256xf32>
      %c0_20 = arith.constant 0 : index
      %c0_21 = arith.constant 0 : index
      %58 = vector.load %arg4[%c0_20, %c0_21] : memref<8x256xf32, #tpu.memory_space<vmem>>, vector<8x256xf32>
      tpu.vector_store %arg4[%c0_20, %c0_21], %57 {strides = array<i32>} : memref<8x256xf32, #tpu.memory_space<vmem>>, vector<8x256xf32>,
    } else {
    }
    %c0 = arith.constant 0 : index
    %c0_1 = arith.constant 0 : index
    %3 = vector.load %arg2[%c0, %c0_1] : memref<32x128xbf16, #tpu.memory_space<vmem>>, vector<32x128xbf16>
    %c0_2 = arith.constant 0 : index
    %c0_3 = arith.constant 0 : index
    %4 = vector.load %arg3[%c0_2, %c0_3] : memref<128x256xbf16, #tpu.memory_space<vmem>>, vector<128x256xbf16>
    %cst = arith.constant dense<0.000000e+00> : vector<32x256xf32>
    %5 = tpu.matmul %3, %4, %cst {dimension_numbers = #tpu.dot_dimension_numbers<[1], [0], [0], [1], [0, 0, 1, 1], [], []>} : vector<32x128xbf16>, vector<128x256xbf16>, vector<32x256xf32> -> vector<32x256xf32>
    %6 = vector.extract_strided_slice %5 {offsets = [0, 0], sizes = [16, 128], strides = [1, 1]} : vector<32x256xf32> to vector<16x128xf32>
    %7 = vector.extract_strided_slice %5 {offsets = [0, 128], sizes = [16, 128], strides = [1, 1]} : vector<32x256xf32> to vector<16x128xf32>
    %8 = vector.extract_strided_slice %5 {offsets = [16, 0], sizes = [16, 128], strides = [1, 1]} : vector<32x256xf32> to vector<16x128xf32>
    %9 = vector.extract_strided_slice %5 {offsets = [16, 128], sizes = [16, 128], strides = [1, 1]} : vector<32x256xf32> to vector<16x128xf32>
    %10 = arith.mulf %6, %6 : vector<16x128xf32>
    %11 = arith.mulf %7, %7 : vector<16x128xf32>
    %12 = arith.addf %10, %11 : vector<16x128xf32>
    %13 = arith.mulf %8, %8 : vector<16x128xf32>
    %14 = arith.mulf %9, %9 : vector<16x128xf32>
    %15 = arith.addf %13, %14 : vector<16x128xf32>
    %cst_4 = arith.constant 1.000000e-24 : f32
    %16 = vector.broadcast %cst_4 : f32 to vector<16x128xf32>
    %17 = arith.addf %12, %16 : vector<16x128xf32>
    %18 = math.log %17 : vector<16x128xf32>
    %cst_5 = arith.constant 1.500000e-01 : f32
    %19 = vector.broadcast %cst_5 : f32 to vector<16x128xf32>
    %20 = arith.mulf %19, %18 : vector<16x128xf32>
    %21 = math.exp %20 : vector<16x128xf32>
    %cst_6 = arith.constant 1.000000e-24 : f32
    %22 = vector.broadcast %cst_6 : f32 to vector<16x128xf32>
    %23 = arith.addf %15, %22 : vector<16x128xf32>
    %24 = math.log %23 : vector<16x128xf32>
    %cst_7 = arith.constant 1.500000e-01 : f32
    %25 = vector.broadcast %cst_7 : f32 to vector<16x128xf32>
    %26 = arith.mulf %25, %24 : vector<16x128xf32>
    %27 = math.exp %26 : vector<16x128xf32>
    %cst_8 = arith.constant 1.000000e-16 : f32
    %28 = vector.broadcast %cst_8 : f32 to vector<16x128xf32>
    %29 = arith.addf %12, %28 : vector<16x128xf32>
    %30 = math.rsqrt %29 : vector<16x128xf32>
    %31 = arith.mulf %21, %30 : vector<16x128xf32>
    %cst_9 = arith.constant 1.000000e-16 : f32
    %32 = vector.broadcast %cst_9 : f32 to vector<16x128xf32>
    %33 = arith.addf %15, %32 : vector<16x128xf32>
    %34 = math.rsqrt %33 : vector<16x128xf32>
    %35 = arith.mulf %27, %34 : vector<16x128xf32>
    %36 = arith.subf %21, %27 : vector<16x128xf32>
    %37 = arith.mulf %36, %36 : vector<16x128xf32>
    %38 = arith.mulf %31, %6 : vector<16x128xf32>
    %39 = arith.mulf %35, %8 : vector<16x128xf32>
    %40 = arith.subf %38, %39 : vector<16x128xf32>
    %41 = arith.mulf %40, %40 : vector<16x128xf32>
    %42 = arith.mulf %31, %7 : vector<16x128xf32>
    %43 = arith.mulf %35, %9 : vector<16x128xf32>
    %44 = arith.subf %42, %43 : vector<16x128xf32>
    %45 = arith.mulf %44, %44 : vector<16x128xf32>
    %46 = arith.addf %41, %45 : vector<16x128xf32>
    %c0_10 = arith.constant 0 : index
    %c0_11 = arith.constant 0 : index
    %47 = vector.load %arg4[%c0_10, %c0_11] : memref<8x256xf32, #tpu.memory_space<vmem>>, vector<8x128xf32>
    %48 = vector.shape_cast %37 : vector<16x128xf32> to vector<2x8x128xf32>
    %cst_12 = arith.constant dense<0.000000e+00> : vector<8x128xf32>
    %49 = vector.multi_reduction <add>, %48, %cst_12 [0] : vector<2x8x128xf32> to vector<8x128xf32>
    %50 = arith.addf %47, %49 : vector<8x128xf32>
    %c0_13 = arith.constant 0 : index
    %c0_14 = arith.constant 0 : index
    %51 = vector.load %arg4[%c0_13, %c0_14] : memref<8x256xf32, #tpu.memory_space<vmem>>, vector<8x128xf32>
    tpu.vector_store %arg4[%c0_13, %c0_14], %50 {strides = array<i32>} : memref<8x256xf32, #tpu.memory_space<vmem>>, vector<8x128xf32>,
    %c0_15 = arith.constant 0 : index
    %c128 = arith.constant 128 : index
    %52 = vector.load %arg4[%c0_15, %c128] : memref<8x256xf32, #tpu.memory_space<vmem>>, vector<8x128xf32>
    %53 = vector.shape_cast %46 : vector<16x128xf32> to vector<2x8x128xf32>
    %cst_16 = arith.constant dense<0.000000e+00> : vector<8x128xf32>
    %54 = vector.multi_reduction <add>, %53, %cst_16 [0] : vector<2x8x128xf32> to vector<8x128xf32>
    %55 = arith.addf %52, %54 : vector<8x128xf32>
    %c0_17 = arith.constant 0 : index
    %c128_18 = arith.constant 128 : index
    %56 = vector.load %arg4[%c0_17, %c128_18] : memref<8x256xf32, #tpu.memory_space<vmem>>, vector<8x128xf32>
    tpu.vector_store %arg4[%c0_17, %c128_18], %55 {strides = array<i32>} : memref<8x256xf32, #tpu.memory_space<vmem>>, vector<8x128xf32>,
    return
  }
  func.func @transform_0(%arg0: i32, %arg1: i32) -> (i32, i32) {
    %c1_i32 = arith.constant 1 : i32
    %0 = arith.muli %arg0, %c1_i32 : i32
    %1 = arith.addi %0, %arg1 : i32
    %c0_i32 = arith.constant 0 : i32
    %c0_i32_0 = arith.constant 0 : i32
    return %1, %c0_i32 : i32, i32
  }
  func.func @transform_1(%arg0: i32, %arg1: i32) -> (i32, i32) {
    %c0_i32 = arith.constant 0 : i32
    %c0_i32_0 = arith.constant 0 : i32
    %c0_i32_1 = arith.constant 0 : i32
    return %c0_i32, %c0_i32_0 : i32, i32
  }
  func.func @transform_2(%arg0: i32, %arg1: i32) -> (i32, i32) {
    %c0_i32 = arith.constant 0 : i32
    %c0_i32_0 = arith.constant 0 : i32
    return %arg0, %c0_i32 : i32, i32
  }
}

</mosaic_0001>

<bundles_post_ra>
// kernel: tpu_custom_call.1
= control target key start
LH: loop header
LB: loop body
LE: loop exit
PB: predicated region body
PF: predicated region fallthrough
CT: control target
= control target key end

     0   :  { %7 = vsyncpa [#allocation3], 0  ;;  %s533_s0 = inlined_call_operand.hbm [shape: bf16[32,128], index: 0, kind: input, shape index: {}]   ;;  %s534_s1 = inlined_call_operand.hbm [shape: bf16[128,256], index: 1, kind: input, shape index: {}]   ;;  %s535_s2 = inlined_call_operand.hbm [shape: f32[8,256], index: 2, kind: output, shape index: {}]  }
   0x1   :  { %8 = vsyncpa [#allocation6], 0 }
   0x2   :  { %9 = vsyncpa [#allocation4], 0  ;;  %s471_s9 = smov [#allocation2]  }
   0x3   :  { %s19_s10 = sshll.u32 %s471_s9, 4  ;;  %s20_s10 = int_to_ptr.vmem [resolvable:$true] %s19_s10 }
   0x4   :  { %s413_s11 = scalar_lea.vmem %s20_s10, 256  ;;  %p418_p1 = scmp.lt.s32.totalorder %s20_s10, %s20_s10 }
   0x5   :  { %p414_p0 = scmp.ne.s32.totalorder %s20_s10, %s413_s11  ;;  %p419_p2 = scmp.lt.s32.totalorder %s413_s11, %s413_s11 }
   0x7   :  { %p420_p3 = por %p419_p2, %p418_p1 }
   0x9   :  { %p421_p4 = pnand %p420_p3, %p414_p0 }
   0xb   :  { %424 = shalt.err (!%p421_p4)
}
   0xc   :  { %s472_s12 = smov 64   ;;  %s473_s13 = smov 4  }
   0xd   :  { %25 = dma.hbm_to_vmem [thread:$0]  %s533_s0, 256, %s20_s10, [#allocation3], %s472_s12, %s472_s12, %s473_s13  }
   0xe   :  { %s474_s16 = smov [#allocation5]  }
   0xf   :  { %s31_s17 = sshll.u32 %s474_s16, 4  ;;  %s32_s17 = int_to_ptr.vmem [resolvable:$true] %s31_s17 }
  0x10   :  { %s433_s18 = scalar_lea.vmem %s32_s17, 2048  ;;  %p438_p6 = scmp.lt.s32.totalorder %s32_s17, %s32_s17 }
  0x11   :  { %p434_p5 = scmp.ne.s32.totalorder %s32_s17, %s433_s18  ;;  %p439_p7 = scmp.lt.s32.totalorder %s433_s18, %s433_s18 }
  0x13   :  { %p440_p8 = por %p439_p7, %p438_p6 }
  0x15   :  { %p441_p9 = pnand %p440_p8, %p434_p5 }
  0x17   :  { %444 = shalt.err (!%p441_p9)
}
  0x18   :  { %s475_s19 = smov 128   ;;  %s476_s20 = smov 8  }
  0x19   :  { %37 = dma.hbm_to_vmem [thread:$0]  %s534_s1, 2048, %s32_s17, [#allocation6], %s475_s19, %s475_s19, %s476_s20  }
  0x1a   :  { %465 = dma.done.wait [#allocation3], 256  }
  0x1b   :  { %466 = vsyncadd [#allocation3], 4294967040 }
  0x1c   :  { %467 = dma.done.wait [#allocation6], 2048  }
  0x1d   :  { %468 = vsyncadd [#allocation6], 4294965248  ;;  %v477_v0 = vmov 0   ;;  %v355_v1 = vld [vmem:[#allocation5 + $0x74] ss:$8 sps:$4 sm:$0xff]   ;;  %s478_s0 = smov [#allocation7]  }
  0x1e   :  { %197 = vmatprep.mubr.bf16.mxu0 %v477_v0  ;;  %207 = vmatprep.mubr.bf16.mxu1 %v477_v0  ;;  %v357_v2 = vld [vmem:[#allocation5 + $0x70] ss:$8 sps:$4 sm:$0xff]   ;;  %v358_v3 = vld [vmem:[#allocation5 + $0x64] ss:$8 sps:$4 sm:$0xff]   ;;  %v360_v4 = vld [vmem:[#allocation5 + $0x60] ss:$8 sps:$4 sm:$0xff]  }
  0x1f   :  { %165 = vmatprep.subr.bf16.mxu0 %v355_v1  ;;  %330 = vmatprep.subr.bf16.mxu1 %v355_v1  ;;  %v361_v5 = vld [vmem:[#allocation5 + $0x54] ss:$8 sps:$4 sm:$0xff]   ;;  %v363_v6 = vld [vmem:[#allocation5 + $0x50] ss:$8 sps:$4 sm:$0xff]   ;;  %v364_v7 = vld [vmem:[#allocation5 + $0x44] ss:$8 sps:$4 sm:$0xff]  }
  0x20   :  { %166 = vmatpush1.bf16.msra.mxu0 %v357_v2  ;;  %338 = vmatpush1.bf16.msra.mxu1 %v357_v2  ;;  %v366_v8 = vld [vmem:[#allocation5 + $0x40] ss:$8 sps:$4 sm:$0xff]   ;;  %v367_v9 = vld [vmem:[#allocation5 + $0x34] ss:$8 sps:$4 sm:$0xff]   ;;  %v369_v10 = vld [vmem:[#allocation5 + $0x30] ss:$8 sps:$4 sm:$0xff]  }
  0x21   :  { %167 = vmatprep.subr.bf16.mxu0 %v358_v3  ;;  %331 = vmatprep.subr.bf16.mxu1 %v358_v3  ;;  %v370_v11 = vld [vmem:[#allocation5 + $0x24] ss:$8 sps:$4 sm:$0xff]   ;;  %v372_v12 = vld [vmem:[#allocation5 + $0x20] ss:$8 sps:$4 sm:$0xff]   ;;  %v373_v13 = vld [vmem:[#allocation5 + $0x14] ss:$8 sps:$4 sm:$0xff]  }
  0x22   :  { %v375_v14 = vld [vmem:[#allocation5 + $0x10] ss:$8 sps:$4 sm:$0xff]   ;;  %v376_v15 = vld [vmem:[#allocation5 + $0x4] ss:$8 sps:$4 sm:$0xff]   ;;  %v378_v16 = vld [vmem:[#allocation5] ss:$8 sps:$4 sm:$0xff]  }
  0x23   :  { %v379_v17 = vld [vmem:[#allocation2] sm:$0xff]   ;;  %v380_v18 = vld [vmem:[#allocation2 + $0x8] sm:$0xff]   ;;  %s302_s1 = sshll.u32 %s478_s0, 4  ;;  %s303_s1 = int_to_ptr.vmem [resolvable:$true] %s302_s1 }
  0x24   :  { %168 = vmatpush1.bf16.msra.mxu0 %v360_v4  ;;  %339 = vmatpush1.bf16.msra.mxu1 %v360_v4  ;;  %s445_s23 = scalar_lea.vmem %s303_s1, 256  ;;  %p450_p11 = scmp.lt.s32.totalorder %s303_s1, %s303_s1 }
  0x25   :  { %169 = vmatprep.subr.bf16.mxu0 %v361_v5  ;;  %332 = vmatprep.subr.bf16.mxu1 %v361_v5  ;;  %p446_p10 = scmp.ne.s32.totalorder %s303_s1, %s445_s23  ;;  %p451_p12 = scmp.lt.s32.totalorder %s445_s23, %s445_s23 }
  0x27   :  { %p452_p13 = por %p451_p12, %p450_p11 }
  0x28   :  { %170 = vmatpush1.bf16.msra.mxu0 %v363_v6  ;;  %340 = vmatpush1.bf16.msra.mxu1 %v363_v6 }
  0x29   :  { %171 = vmatprep.subr.bf16.mxu0 %v364_v7  ;;  %333 = vmatprep.subr.bf16.mxu1 %v364_v7  ;;  %p453_p0 = pnand %p452_p13, %p446_p10 }
  0x2c   :  { %172 = vmatpush1.bf16.msra.mxu0 %v366_v8  ;;  %341 = vmatpush1.bf16.msra.mxu1 %v366_v8 }
  0x2d   :  { %173 = vmatprep.subr.bf16.mxu0 %v367_v9  ;;  %334 = vmatprep.subr.bf16.mxu1 %v367_v9 }
  0x30   :  { %174 = vmatpush1.bf16.msra.mxu0 %v369_v10  ;;  %342 = vmatpush1.bf16.msra.mxu1 %v369_v10 }
  0x31   :  { %175 = vmatprep.subr.bf16.mxu0 %v370_v11  ;;  %335 = vmatprep.subr.bf16.mxu1 %v370_v11 }
  0x34   :  { %176 = vmatpush1.bf16.msra.mxu0 %v372_v12  ;;  %343 = vmatpush1.bf16.msra.mxu1 %v372_v12 }
  0x35   :  { %177 = vmatprep.subr.bf16.mxu0 %v373_v13  ;;  %336 = vmatprep.subr.bf16.mxu1 %v373_v13 }
  0x38   :  { %178 = vmatpush1.bf16.msra.mxu0 %v375_v14  ;;  %344 = vmatpush1.bf16.msra.mxu1 %v375_v14 }
  0x39   :  { %179 = vmatprep.subr.bf16.mxu0 %v376_v15  ;;  %337 = vmatprep.subr.bf16.mxu1 %v376_v15 }
  0x3c   :  { %180 = vmatpush1.bf16.msra.mxu0 %v378_v16  ;;  %345 = vmatpush1.bf16.msra.mxu1 %v378_v16 }
  0x3f   :  { %198 = vmatmul.mubr.bf16.vlgmr.msra.gmra.mxu0 %v379_v17  ;;  %208 = vmatmul.mubr.bf16.vlgmr.msra.gmra.mxu1 %v380_v18 }
  0xff   :  { %v199_v19 = vpop.f32.mrf.mxu0  ;;  %v500_v20 = vpop.f32.mrf.mxu1 }
 0x100   :  { %v218_v23 = vmul.f32 %v199_v19, %v199_v19  ;;  %v224_v24 = vmul.f32 %v500_v20, %v500_v20 }
 0x101   :  { %v201_v21 = vpop.f32.mrf.mxu0  ;;  %v502_v22 = vpop.f32.mrf.mxu1 }
 0x102   :  { %v220_v25 = vmul.f32 %v201_v21, %v201_v21  ;;  %v226_v26 = vmul.f32 %v502_v22, %v502_v22 }
 0x103   :  { %v508_v27 = vpop.f32.mrf.mxu0  ;;  %v510_v28 = vpop.f32.mrf.mxu1 }
 0x104   :  { %v222_v29 = vadd.f32 %v220_v25, %v218_v23  ;;  %v228_v30 = vadd.f32 %v226_v26, %v224_v24  ;;  %v219_v35 = vmul.f32 %v508_v27, %v508_v27  ;;  %v225_v37 = vmul.f32 %v510_v28, %v510_v28 }
 0x105   :  { %v512_v31 = vpop.f32.mrf.mxu0  ;;  %v514_v32 = vpop.f32.mrf.mxu1 }
 0x106   :  { %v230_v33 = vadd.f32 1e-24, %v222_v29  ;;  %v242_v34 = vadd.f32 1e-24, %v228_v30  ;;  %v221_v36 = vmul.f32 %v512_v31, %v512_v31  ;;  %v227_v38 = vmul.f32 %v514_v32, %v514_v32 }
 0x107   :  { %v254_v46 = vadd.f32 1e-16, %v222_v29  ;;  %v260_v50 = vadd.f32 1e-16, %v228_v30 }
 0x108   :  { %381 = vlog2.f32 %v230_v33  ;;  %v223_v39 = vadd.f32 %v221_v36, %v219_v35  ;;  %v229_v40 = vadd.f32 %v227_v38, %v225_v37 }
 0x109   :  { %383 = vlog2.f32 %v242_v34 }
 0x10a   :  { %v231_v41 = vadd.f32 1e-24, %v223_v39  ;;  %v243_v42 = vadd.f32 1e-24, %v229_v40  ;;  %v255_v55 = vadd.f32 1e-16, %v223_v39 }
 0x10b   :  { %v261_v61 = vadd.f32 1e-16, %v229_v40 }
 0x10c   :  { %385 = vlog2.f32 %v231_v41 }
 0x10d   :  { %387 = vlog2.f32 %v243_v42 }
 0x10e   :  { %389 = vrsqrt.f32 %v254_v46 }
 0x115   :  { %v382_v43 = vpop.eup %381 }
 0x116   :  { %v233_v44 = vmul.f32 0.6931472, %v382_v43  ;;  %v384_v45 = vpop.eup %383 }
 0x117   :  { %v245_v48 = vmul.f32 0.6931472, %v384_v45 }
 0x118   :  { %v236_v47 = vmul.f32 0.15, %v233_v44 }
 0x119   :  { %v386_v49 = vpop.eup %385  ;;  %v248_v52 = vmul.f32 0.15, %v245_v48 }
 0x11a   :  { %v238_v51 = vmul.f32 1.442695, %v236_v47  ;;  %v235_v53 = vmul.f32 0.6931472, %v386_v49  ;;  %v388_v54 = vpop.eup %387 }
 0x11b   :  { %v250_v56 = vmul.f32 1.442695, %v248_v52  ;;  %v247_v58 = vmul.f32 0.6931472, %v388_v54  ;;  %v390_v63 = vpop.eup %389 }
 0x11c   :  { %391 = vpow2.f32 %v238_v51  ;;  %v237_v57 = vmul.f32 0.15, %v235_v53 }
 0x11d   :  { %393 = vrsqrt.f32 %v260_v50  ;;  %v249_v60 = vmul.f32 0.15, %v247_v58 }
 0x11e   :  { %395 = vpow2.f32 %v250_v56  ;;  %v240_v59 = vmul.f32 1.442695, %v237_v57 }
 0x11f   :  { %397 = vrsqrt.f32 %v255_v55  ;;  %v252_v62 = vmul.f32 1.442695, %v249_v60 }
 0x120   :  { %399 = vpow2.f32 %v240_v59 }
 0x121   :  { %401 = vpow2.f32 %v252_v62 }
 0x122   :  { %403 = vrsqrt.f32 %v261_v61 }
 0x129   :  { %v392_v0 = vpop.eup %391 }
 0x12a   :  { %v394_v1 = vpop.eup %393  ;;  %v258_v2 = vmul.f32 %v392_v0, %v390_v63 }
 0x12b   :  { %v396_v3 = vpop.eup %395 }
 0x12c   :  { %v398_v4 = vpop.eup %397  ;;  %v270_v5 = vmul.f32 %v258_v2, %v199_v19  ;;  %v278_v6 = vmul.f32 %v258_v2, %v201_v21  ;;  %v264_v7 = vmul.f32 %v396_v3, %v394_v1  ;;  %v266_v13 = vsub.f32 %v392_v0, %v396_v3 }
 0x12d   :  { %v400_v8 = vpop.eup %399 }
 0x12e   :  { %v272_v9 = vmul.f32 %v264_v7, %v500_v20  ;;  %v280_v10 = vmul.f32 %v264_v7, %v502_v22  ;;  %v259_v11 = vmul.f32 %v400_v8, %v398_v4  ;;  %v402_v12 = vpop.eup %401  ;;  %v268_v25 = vmul.f32 %v266_v13, %v266_v13 }
 0x12f   :  { %v404_v14 = vpop.eup %403  ;;  %v267_v24 = vsub.f32 %v400_v8, %v402_v12 }
 0x130   :  { %v274_v15 = vsub.f32 %v270_v5, %v272_v9  ;;  %v282_v16 = vsub.f32 %v278_v6, %v280_v10  ;;  %v271_v17 = vmul.f32 %v259_v11, %v508_v27  ;;  %v279_v18 = vmul.f32 %v259_v11, %v512_v31 }
 0x131   :  { %v265_v23 = vmul.f32 %v404_v14, %v402_v12  ;;  %v269_v20 = vmul.f32 %v267_v24, %v267_v24 }
 0x132   :  { %v276_v26 = vmul.f32 %v274_v15, %v274_v15  ;;  %v284_v22 = vmul.f32 %v282_v16, %v282_v16 }
 0x133   :  { %v273_v19 = vmul.f32 %v265_v23, %v510_v28  ;;  %v281_v21 = vmul.f32 %v265_v23, %v514_v32  ;;  %v289_v33 = vadd.f32 %v269_v20, %v268_v25 }
 0x134   :  { %v286_v36 = vadd.f32 %v284_v22, %v276_v26 }
 0x135   :  { %v275_v29 = vsub.f32 %v271_v17, %v273_v19  ;;  %v283_v30 = vsub.f32 %v279_v18, %v281_v21  ;;  %291 = vst [vmem:[#allocation7] sm:$0xff] %v289_v33 }
 0x137   :  { %v277_v34 = vmul.f32 %v275_v29, %v275_v29  ;;  %v285_v35 = vmul.f32 %v283_v30, %v283_v30 }
 0x139   :  { %v287_v37 = vadd.f32 %v285_v35, %v277_v34 }
 0x13b   :  { %v293_v27 = vadd.f32 %v287_v37, %v286_v36 }
 0x13d   :  { %295 = vst [vmem:[#allocation7 + $0x8] sm:$0xff] %v293_v27 }
 0x13e   :  { %456 = shalt.err (!%p453_p0)
}
 0x13f   :  { %305 = dma.vmem_to_hbm [thread:$0]  %s303_s1, 256, %s535_s2, [#allocation4]  }
 0x140   :  { %469 = dma.done.wait [#allocation4], 256  }
 0x141   :  { %470 = vsyncadd [#allocation4], 4294967040 }
 0x142   :  { %309 = vsyncpa [#allocation3], 1 }
 0x143   :  { %310 = vsyncpa [#allocation6], 1 }
 0x144   :  { %311 = vsyncpa [#allocation4], 1 }

</bundles_post_ra>
